<compile_context>
chip_gen: v7x
topology: tpu7x:2x2x1
jax: 0.10.0
libtpu: 0.0.40
codegen_flags: <defaults>
</compile_context>

<pallas_src>
import functools

import jax
import jax.numpy as jnp
from jax import lax
from jax.experimental import pallas as pl
from jax.experimental.pallas import tpu as pltpu


def _round_up(x, m):
    return ((x + m - 1) // m) * m


# --------------------------------------------------------------------------
# Kernel 1: conv-as-matmul (bf16 MXU inputs, f32 accumulation), optionally
#           fused with per-M-tile partial channel sum / sum-of-squares for BN,
#           optionally fused with ReLU (bn=False path).
#           grid = (M tiles [parallel], K tiles [arbitrary])
# --------------------------------------------------------------------------
def conv_stats_kernel(p_ref, w_ref, *rest, tk, apply_relu, compute_stats,
                      weight_resident):
    if compute_stats:
        o_ref, sum_ref, sq_ref, acc_ref = rest
    else:
        o_ref, acc_ref = rest

    k = pl.program_id(1)

    @pl.when(k == 0)
    def _():
        acc_ref[...] = jnp.zeros_like(acc_ref)

    if weight_resident:
        # Weight lives in VMEM for the whole grid (constant block index); slice the
        # current K chunk out of the resident block.
        k_off = pl.multiple_of(k * tk, tk)
        w_blk = w_ref[pl.ds(k_off, tk), :]
    else:
        w_blk = w_ref[...]

    acc_ref[...] += jnp.dot(p_ref[...], w_blk,
                            preferred_element_type=jnp.float32)

    @pl.when(k == pl.num_programs(1) - 1)
    def _():
        acc = acc_ref[...]
        y = jnp.maximum(acc, 0.0) if apply_relu else acc
        o_ref[...] = y.astype(o_ref.dtype)
        if compute_stats:
            # Per-tile partial stats (reduced in the wrapper) so the M axis stays
            # "parallel" (megacore-friendly).  Stats come from the f32 accumulator,
            # before any cast of the stored intermediate.
            psum = jnp.sum(acc, axis=0, keepdims=True)        # (1, Cout_s)
            psq = jnp.sum(acc * acc, axis=0, keepdims=True)   # (1, Cout_s)
            sum_ref[...] = jnp.broadcast_to(psum[None], sum_ref.shape)
            sq_ref[...] = jnp.broadcast_to(psq[None], sq_ref.shape)


# --------------------------------------------------------------------------
# Kernel 2: fused BN affine (scale/shift) + ReLU, elementwise over M tiles.
#           Reads the bf16 intermediate, computes in f32, writes f32.
# --------------------------------------------------------------------------
def bn_relu_kernel(y_ref, scale_ref, shift_ref, o_ref, *, apply_relu):
    y = y_ref[...].astype(jnp.float32) * scale_ref[...] + shift_ref[...]
    if apply_relu:
        y = jnp.maximum(y, 0.0)
    o_ref[...] = y.astype(o_ref.dtype)


# --------------------------------------------------------------------------
# Wrapper: im2col glue (bf16) + one or two pallas_calls
# --------------------------------------------------------------------------
def basic_conv_forward(x_nchw, weight, gamma=None, beta=None, *, stride=1,
                       padding=0, dilation=1, relu=True, bn=True, eps=1e-5,
                       tm=512, nchw_output=True):
    """Forward pass of BasicConv (groups=1, bias=False).

    x_nchw: (N, Cin, H, W) float32.  weight: (Cout, Cin, kh, kw).
    gamma/beta: (Cout,).  Returns (N, Cout, Hout, Wout) float32 (NCHW), or NHWC
    if nchw_output=False.
    """
    N, Cin, H, W = x_nchw.shape
    Cout, _, kh, kw = weight.shape

    H_out = (H + 2 * padding - dilation * (kh - 1) - 1) // stride + 1
    W_out = (W + 2 * padding - dilation * (kw - 1) - 1) // stride + 1

    # ---- glue: NCHW -> NHWC, pad, im2col (bf16 halves the materialized traffic) -----
    # TODO(synk): replace with in-kernel window DMA from the padded NHWC input.
    x = jnp.transpose(x_nchw, (0, 2, 3, 1)).astype(jnp.bfloat16)   # N,H,W,Cin
    x = jnp.pad(x, ((0, 0), (padding, padding), (padding, padding), (0, 0)))

    cols = []
    for ki in range(kh):
        for kj in range(kw):
            h0 = ki * dilation
            w0 = kj * dilation
            sl = x[:, h0:h0 + (H_out - 1) * stride + 1:stride,
                   w0:w0 + (W_out - 1) * stride + 1:stride, :]
            cols.append(sl)                                # (N, Hout, Wout, Cin)
    patches = jnp.concatenate(cols, axis=-1)               # (N,Hout,Wout, kh*kw*Cin)
    K = kh * kw * Cin
    M = N * H_out * W_out
    patches = patches.reshape(M, K)

    # weight (Cout,Cin,kh,kw) -> (kh,kw,Cin,Cout) -> (K, Cout); matches patch ordering
    w_mat = jnp.transpose(weight, (2, 3, 1, 0)).reshape(K, Cout).astype(jnp.bfloat16)

    # ---- output-channel layout: lane-pad to 128 unless Cout is tiny -----------------
    # For Cout <= 32 the 128-lane zero padding would inflate the stored intermediate /
    # output stream 4-16x; masked stores are cheaper than that on HBM-bound layers.
    Cout_s = Cout if Cout <= 32 else _round_up(Cout, 128)
    if Cout_s != Cout:
        w_mat = jnp.pad(w_mat, ((0, 0), (0, Cout_s - Cout)))

    # ---- K tiling (lane-dense when K >= 128; zeros are neutral) ---------------------
    if K <= 1024:
        K_pad = _round_up(K, 128 if K >= 128 else 16)
        tk = K_pad                       # single K step
    else:
        tk = 512
        K_pad = _round_up(K, tk)
    if K_pad != K:
        patches = jnp.pad(patches, ((0, 0), (0, K_pad - K)))
        w_mat = jnp.pad(w_mat, ((0, K_pad - K), (0, 0)))
    grid_k = K_pad // tk

    # ---- M tiling: minimize padding waste, keep >= 2 tiles for megacore (v7x) -------
    n_tiles = pl.cdiv(M, tm)
    if n_tiles == 1 and M >= 256:
        n_tiles = 2                      # both TensorCores get an M tile on v7x
    tm = _round_up(pl.cdiv(M, n_tiles), 16)
    M_pad = _round_up(M, tm)
    if M_pad != M:
        patches = jnp.pad(patches, ((0, M_pad - M), (0, 0)))
    grid_m = M_pad // tm

    # ---- weight residency: DMA the whole weight once when it fits a small budget ----
    weight_resident = (grid_k > 1) and (K_pad * Cout_s * 2 <= 12 * 1024 * 1024)
    if weight_resident:
        w_spec = pl.BlockSpec((K_pad, Cout_s), lambda i, k: (0, 0))
    else:
        # With grid_k == 1 the block index is constant anyway (fetched once).
        w_spec = pl.BlockSpec((tk, Cout_s), lambda i, k: (k, 0))

    compute_stats = bool(bn)
    inter_dtype = jnp.bfloat16 if bn else jnp.float32   # bf16 intermediate when BN follows

    kern = functools.partial(conv_stats_kernel, tk=tk,
                             apply_relu=(relu and not bn),
                             compute_stats=compute_stats,
                             weight_resident=weight_resident)

    if compute_stats:
        out_shape = (jax.ShapeDtypeStruct((M_pad, Cout_s), inter_dtype),
                     jax.ShapeDtypeStruct((grid_m, 8, Cout_s), jnp.float32),
                     jax.ShapeDtypeStruct((grid_m, 8, Cout_s), jnp.float32))
        out_specs = (pl.BlockSpec((tm, Cout_s), lambda i, k: (i, 0)),
                     pl.BlockSpec((1, 8, Cout_s), lambda i, k: (i, 0, 0)),
                     pl.BlockSpec((1, 8, Cout_s), lambda i, k: (i, 0, 0)))
    else:
        out_shape = jax.ShapeDtypeStruct((M_pad, Cout_s), jnp.float32)
        out_specs = pl.BlockSpec((tm, Cout_s), lambda i, k: (i, 0))

    res = pl.pallas_call(
        kern,
        out_shape=out_shape,
        grid_spec=pltpu.PrefetchScalarGridSpec(
            num_scalar_prefetch=0,
            grid=(grid_m, grid_k),
            in_specs=[pl.BlockSpec((tm, tk), lambda i, k: (i, k)), w_spec],
            out_specs=out_specs,
            scratch_shapes=[pltpu.VMEM((tm, Cout_s), jnp.float32)]),
        compiler_params=pltpu.CompilerParams(
            dimension_semantics=("parallel", "arbitrary"),
            vmem_limit_bytes=48 * 1024 * 1024),      # v7x-safe, ample on v5e/v6e
    )(patches, w_mat)

    if bn:
        conv_out, sum_part, sq_part = res
        f32 = jnp.float32
        # Training-mode BatchNorm2d: biased batch statistics over (N, H, W).
        # NOTE: var = E[y^2] - E[y]^2 in f32; adequate for conv activations here
        # (batch mean << batch std), but a shifted/Welford combine would be more
        # robust for strongly biased pre-activations.
        ch_sum = jnp.sum(sum_part[:, 0, :], axis=0)        # (Cout_s,)
        ch_sq = jnp.sum(sq_part[:, 0, :], axis=0)          # (Cout_s,)
        mean = ch_sum / M
        var = jnp.maximum(ch_sq / M - mean * mean, 0.0)
        gamma_p = jnp.pad(gamma.astype(f32), (0, Cout_s - Cout))
        beta_p = jnp.pad(beta.astype(f32), (0, Cout_s - Cout))
        inv_std = lax.rsqrt(var + eps)
        scale = gamma_p * inv_std
        shift = beta_p - mean * scale
        scale = scale.reshape(1, Cout_s)
        shift = shift.reshape(1, Cout_s)

        # ---- pallas call 2: fused BN affine + ReLU over the bf16 intermediate -------
        out_flat = pl.pallas_call(
            functools.partial(bn_relu_kernel, apply_relu=relu),
            out_shape=jax.ShapeDtypeStruct((M_pad, Cout_s), jnp.float32),
            grid_spec=pltpu.PrefetchScalarGridSpec(
                num_scalar_prefetch=0,
                grid=(grid_m,),
                in_specs=[
                    pl.BlockSpec((tm, Cout_s), lambda i: (i, 0)),
                    pl.BlockSpec((1, Cout_s), lambda i: (0, 0)),
                    pl.BlockSpec((1, Cout_s), lambda i: (0, 0)),
                ],
                out_specs=pl.BlockSpec((tm, Cout_s), lambda i: (i, 0))),
            compiler_params=pltpu.CompilerParams(
                dimension_semantics=("parallel",),
                vmem_limit_bytes=32 * 1024 * 1024),
        )(conv_out, scale, shift)
    else:
        out_flat = res   # ReLU already applied (if requested) in kernel 1's epilogue

    out = out_flat[:M]
    if Cout_s != Cout:
        out = out[:, :Cout]
    out = out.reshape(N, H_out, W_out, Cout)
    if nchw_output:
        # NOTE: this transpose is one extra full HBM read+write of the output in XLA;
        # kept only because the PyTorch module returns NCHW.
        out = jnp.transpose(out, (0, 3, 1, 2))
    return out


# --------------------------------------------------------------------------
# Pure-JAX reference (for a correctness check)
# --------------------------------------------------------------------------
def reference_forward(x, weight, gamma, beta, *, stride, padding, dilation,
                      relu, bn, eps=1e-5):
    y = lax.conv_general_dilated(
        x, weight, window_strides=(stride, stride),
        padding=[(padding, padding), (padding, padding)],
        rhs_dilation=(dilation, dilation),
        dimension_numbers=("NCHW", "OIHW", "NCHW"),
        precision=lax.Precision.HIGHEST)
    if bn:
        mean = jnp.mean(y, axis=(0, 2, 3), keepdims=True)
        var = jnp.mean((y - mean) ** 2, axis=(0, 2, 3), keepdims=True)
        y = (y - mean) / jnp.sqrt(var + eps)
        y = y * gamma.reshape(1, -1, 1, 1) + beta.reshape(1, -1, 1, 1)
    if relu:
        y = jnp.maximum(y, 0.0)
    return y


if __name__ == "__main__":
    # BasicConv(in_planes=4, out_planes=8, kernel_size=3, stride=1, padding=1,
    #           relu=True, bn=True, bias=False)
    N, Cin, H, W = 2, 4, 16, 16
    Cout, ksize, stride, padding, dilation = 8, 3, 1, 1, 1

    key = jax.random.PRNGKey(0)
    kx, kw_, kg, kb = jax.random.split(key, 4)
    # Quantize conv inputs to bf16-representable f32 so the bf16 MXU path is
    # bit-compatible with the f32 reference (tight tolerance check).
    x = jax.random.normal(kx, (N, Cin, H, W), dtype=jnp.float32)
    x = x.astype(jnp.bfloat16).astype(jnp.float32)
    weight = 0.1 * jax.random.normal(kw_, (Cout, Cin, ksize, ksize), dtype=jnp.float32)
    weight = weight.astype(jnp.bfloat16).astype(jnp.float32)
    gamma = 1.0 + 0.1 * jax.random.normal(kg, (Cout,), dtype=jnp.float32)
    beta = 0.1 * jax.random.normal(kb, (Cout,), dtype=jnp.float32)

    out = basic_conv_forward(x, weight, gamma, beta, stride=stride,
                             padding=padding, dilation=dilation,
                             relu=True, bn=True)
    out = jax.block_until_ready(out)

    ref = reference_forward(x, weight, gamma, beta, stride=stride,
                            padding=padding, dilation=dilation,
                            relu=True, bn=True)
    assert out.shape == (N, Cout, H, W), out.shape
    max_err = float(jnp.max(jnp.abs(out - ref)))
    assert jnp.allclose(out, ref, atol=5e-3, rtol=5e-3), max_err

    # Also exercise the bn=False fast path (single pallas_call, ReLU fused in epilogue).
    out2 = jax.block_until_ready(
        basic_conv_forward(x, weight, gamma, beta, stride=stride,
                           padding=padding, dilation=dilation,
                           relu=True, bn=False))
    ref2 = reference_forward(x, weight, gamma, beta, stride=stride,
                             padding=padding, dilation=dilation,
                             relu=True, bn=False)
    assert jnp.allclose(out2, ref2, atol=5e-3, rtol=5e-3)

    print("KERNEL_OK")
</pallas_src>

<mosaic_0001>
module attributes {stable_mosaic.version = 11 : i64} {
  func.func @conv_stats_kernel(%arg0: i32, %arg1: i32, %arg2: memref<256x48xbf16, #tpu.memory_space<vmem>>, %arg3: memref<48x8xbf16, #tpu.memory_space<vmem>>, %arg4: memref<256x8xbf16, #tpu.memory_space<vmem>>, %arg5: memref<1x8x8xf32, #tpu.memory_space<vmem>>, %arg6: memref<1x8x8xf32, #tpu.memory_space<vmem>>, %arg7: memref<256x8xf32, #tpu.memory_space<vmem>>) attributes {dimension_semantics = [#tpu.dimension_semantics<parallel>, #tpu.dimension_semantics<arbitrary>], iteration_bounds = array<i64: 2, 1>, scalar_prefetch = 0 : i64, scratch_operands = 1 : i64, tpu.core_type = #tpu.core_type<tc>, window_params = [{transform_indices = @transform_0, window_bounds = array<i64: 256, 48>}, {transform_indices = @transform_1, window_bounds = array<i64: 48, 8>}, {transform_indices = @transform_2, window_bounds = array<i64: 256, 8>}, {transform_indices = @transform_3, window_bounds = array<i64: 1, 8, 8>}, {transform_indices = @transform_4, window_bounds = array<i64: 1, 8, 8>}]} {
    %c0_i32 = arith.constant 0 : i32
    %0 = arith.cmpi eq, %arg1, %c0_i32 : i32
    %1 = arith.extui %0 : i1 to i32
    %c0_i32_0 = arith.constant 0 : i32
    %2 = arith.cmpi ne, %1, %c0_i32_0 : i32
    scf.if %2 {
      %cst_10 = arith.constant 0.000000e+00 : f32
      %12 = vector.broadcast %cst_10 : f32 to vector<256x8xf32>
      %c0_11 = arith.constant 0 : index
      %c0_12 = arith.constant 0 : index
      %13 = vector.load %arg7[%c0_11, %c0_12] : memref<256x8xf32, #tpu.memory_space<vmem>>, vector<256x8xf32>
      tpu.vector_store %arg7[%c0_11, %c0_12], %12 {strides = array<i32>} : memref<256x8xf32, #tpu.memory_space<vmem>>, vector<256x8xf32>,
    } else {
    }
    %c0 = arith.constant 0 : index
    %c0_1 = arith.constant 0 : index
    %3 = vector.load %arg3[%c0, %c0_1] : memref<48x8xbf16, #tpu.memory_space<vmem>>, vector<48x8xbf16>
    %c0_2 = arith.constant 0 : index
    %c0_3 = arith.constant 0 : index
    %4 = vector.load %arg7[%c0_2, %c0_3] : memref<256x8xf32, #tpu.memory_space<vmem>>, vector<256x8xf32>
    %c0_4 = arith.constant 0 : index
    %c0_5 = arith.constant 0 : index
    %5 = vector.load %arg2[%c0_4, %c0_5] : memref<256x48xbf16, #tpu.memory_space<vmem>>, vector<256x48xbf16>
    %cst = arith.constant dense<0.000000e+00> : vector<256x8xf32>
    %6 = tpu.matmul %5, %3, %cst {dimension_numbers = #tpu.dot_dimension_numbers<[1], [0], [0], [1], [0, 0, 1, 1], [], []>} : vector<256x48xbf16>, vector<48x8xbf16>, vector<256x8xf32> -> vector<256x8xf32>
    %7 = arith.addf %4, %6 : vector<256x8xf32>
    %c0_6 = arith.constant 0 : index
    %c0_7 = arith.constant 0 : index
    %8 = vector.load %arg7[%c0_6, %c0_7] : memref<256x8xf32, #tpu.memory_space<vmem>>, vector<256x8xf32>
    tpu.vector_store %arg7[%c0_6, %c0_7], %7 {strides = array<i32>} : memref<256x8xf32, #tpu.memory_space<vmem>>, vector<256x8xf32>,
    %c0_i32_8 = arith.constant 0 : i32
    %9 = arith.cmpi eq, %arg1, %c0_i32_8 : i32
    %10 = arith.extui %9 : i1 to i32
    %c0_i32_9 = arith.constant 0 : i32
    %11 = arith.cmpi ne, %10, %c0_i32_9 : i32
    scf.if %11 {
      %c0_10 = arith.constant 0 : index
      %c0_11 = arith.constant 0 : index
      %12 = vector.load %arg7[%c0_10, %c0_11] : memref<256x8xf32, #tpu.memory_space<vmem>>, vector<256x8xf32>
      %13 = arith.truncf %12 : vector<256x8xf32> to vector<256x8xbf16>
      %c0_12 = arith.constant 0 : index
      %c0_13 = arith.constant 0 : index
      %14 = vector.load %arg4[%c0_12, %c0_13] : memref<256x8xbf16, #tpu.memory_space<vmem>>, vector<256x8xbf16>
      tpu.vector_store %arg4[%c0_12, %c0_13], %13 {strides = array<i32>} : memref<256x8xbf16, #tpu.memory_space<vmem>>, vector<256x8xbf16>,
      %cst_14 = arith.constant dense<0.000000e+00> : vector<8xf32>
      %15 = vector.multi_reduction <add>, %12, %cst_14 [0] : vector<256x8xf32> to vector<8xf32>
      %16 = vector.shape_cast %15 : vector<8xf32> to vector<1x8xf32>
      %17 = arith.mulf %12, %12 : vector<256x8xf32>
      %cst_15 = arith.constant dense<0.000000e+00> : vector<8xf32>
      %18 = vector.multi_reduction <add>, %17, %cst_15 [0] : vector<256x8xf32> to vector<8xf32>
      %19 = vector.shape_cast %18 : vector<8xf32> to vector<1x8xf32>
      %20 = vector.shape_cast %16 : vector<1x8xf32> to vector<1x1x8xf32>
      %21 = vector.shape_cast %20 : vector<1x1x8xf32> to vector<1x1x8xf32>
      %22 = vector.broadcast %21 : vector<1x1x8xf32> to vector<1x8x8xf32>
      %c0_16 = arith.constant 0 : index
      %c0_17 = arith.constant 0 : index
      %c0_18 = arith.constant 0 : index
      %23 = vector.load %arg5[%c0_16, %c0_17, %c0_18] : memref<1x8x8xf32, #tpu.memory_space<vmem>>, vector<1x8x8xf32>
      tpu.vector_store %arg5[%c0_16, %c0_17, %c0_18], %22 {strides = array<i32>} : memref<1x8x8xf32, #tpu.memory_space<vmem>>, vector<1x8x8xf32>,
      %24 = vector.shape_cast %19 : vector<1x8xf32> to vector<1x1x8xf32>
      %25 = vector.shape_cast %24 : vector<1x1x8xf32> to vector<1x1x8xf32>
      %26 = vector.broadcast %25 : vector<1x1x8xf32> to vector<1x8x8xf32>
      %c0_19 = arith.constant 0 : index
      %c0_20 = arith.constant 0 : index
      %c0_21 = arith.constant 0 : index
      %27 = vector.load %arg6[%c0_19, %c0_20, %c0_21] : memref<1x8x8xf32, #tpu.memory_space<vmem>>, vector<1x8x8xf32>
      tpu.vector_store %arg6[%c0_19, %c0_20, %c0_21], %26 {strides = array<i32>} : memref<1x8x8xf32, #tpu.memory_space<vmem>>, vector<1x8x8xf32>,
    } else {
    }
    return
  }
  func.func @transform_0(%arg0: i32, %arg1: i32) -> (i32, i32) {
    %c0_i32 = arith.constant 0 : i32
    return %arg0, %arg1 : i32, i32
  }
  func.func @transform_1(%arg0: i32, %arg1: i32) -> (i32, i32) {
    %c0_i32 = arith.constant 0 : i32
    %c0_i32_0 = arith.constant 0 : i32
    return %arg1, %c0_i32 : i32, i32
  }
  func.func @transform_2(%arg0: i32, %arg1: i32) -> (i32, i32) {
    %c0_i32 = arith.constant 0 : i32
    %c0_i32_0 = arith.constant 0 : i32
    return %arg0, %c0_i32 : i32, i32
  }
  func.func @transform_3(%arg0: i32, %arg1: i32) -> (i32, i32, i32) {
    %c0_i32 = arith.constant 0 : i32
    %c0_i32_0 = arith.constant 0 : i32
    %c0_i32_1 = arith.constant 0 : i32
    return %arg0, %c0_i32, %c0_i32_0 : i32, i32, i32
  }
  func.func @transform_4(%arg0: i32, %arg1: i32) -> (i32, i32, i32) {
    %c0_i32 = arith.constant 0 : i32
    %c0_i32_0 = arith.constant 0 : i32
    %c0_i32_1 = arith.constant 0 : i32
    return %arg0, %c0_i32, %c0_i32_0 : i32, i32, i32
  }
}

</mosaic_0001>

<bundles_post_ra>
// kernel: tpu_custom_call.1
= control target key start
LH: loop header
LB: loop body
LE: loop exit
PB: predicated region body
PF: predicated region fallthrough
CT: control target
= control target key end

     0   :  { %10 = vsyncpa [#allocation4], 0  ;;  %s2242_s0 = inlined_call_operand.vmem [shape: bf16[512,48], index: 0, kind: input, shape index: {}]   ;;  %s2243_s1 = inlined_call_operand.vmem [shape: bf16[48,8], index: 1, kind: input, shape index: {}]   ;;  %s2244_s2 = inlined_call_operand.vmem [shape: bf16[512,8], index: 2, kind: output, shape index: {0}]   ;;  %s2245_s3 = inlined_call_operand.hbm [shape: f32[2,8,8], index: 3, kind: output, shape index: {1}]   ;;  %s2246_s4 = inlined_call_operand.hbm [shape: f32[2,8,8], index: 4, kind: output, shape index: {2}]  }
   0x1   :  { %12 = vsyncpa [#allocation4 + $0x1], 0 }
   0x2   :  { %13 = vsyncpa [#allocation6], 0 }
   0x3   :  { %15 = vsyncpa [#allocation6 + $0x1], 0  ;;  %s1699_s15 = smov 0   ;;  %s1701_s16 = smov 0  }
   0x4   :  { %s1703_s17 = smov 0   ;;  %s1705_s18 = smov 0  }
   0x5   :  { %s1707_s19 = smov 0   ;;  %s1709_s20 = smov 0  }
   0x6 LB: > { %s1299_s21 = sadd.s32 4294967295, %s1669_s20   ;;  %s1300_s22 = sadd.s32 4294967294, %s1669_s20   ;;  %s1669_s20 = sphi %s1709_s20, %s21_s20   ;;  %s1665_s19 = sphi %s1707_s19, %s2253_s19   ;;  %s1661_s18 = sphi %s1705_s18, %s2252_s18   ;;  %s1657_s17 = sphi %s1703_s17, %s2251_s17   ;;  %s1653_s16 = sphi %s1701_s16, %s2250_s16   ;;  %s1649_s15 = sphi %s1699_s15, %s2249_s15  }
   0x7   : > { %s33_s23 = sadd.s32 1, %s1665_s19  ;;  %s120_s24 = sadd.s32 1, %s1657_s17 }
   0x8   : > { %p35_p0 = scmp.ge.s32.totalorder %s33_s23, 2  ;;  %p130_p1 = scmp.ne.s32.totalorder %s1657_s17, %s1653_s16 }
   0x9   : > { %p131_p2 = scmp.eq.s32.totalorder %s1299_s21, 1  ;;  %p136_p3 = scmp.ne.s32.totalorder %s1653_s16, %s1649_s15 }
   0xa   : > { %s2255_s23 = smov (%p35_p0, %s33_s23), 0  ;;  %p137_p5 = scmp.eq.s32.totalorder %s1300_s22, 1 }
   0xb   : > { %p1739_p4 = por %p131_p2, %p130_p1  ;;  %s117_s26 = ssub.s32 %s1665_s19, %s2255_s23 }
   0xc   : > { %p1304_p6 = scmp.ge.s32.totalorder %s1669_s20, 1  ;;  %p118_p7 = scmp.eq.s32.totalorder %s117_s26, 0 }
   0xd   : > { %p1746_p8 = por %p137_p5, %p136_p3  ;;  %p202_p9 = scmp.lt.s32.totalorder %s1669_s20, 3 }
   0xe   : > { %s1752_s28 = scalar_select %p118_p7, %s1657_s17, %s120_s24  }
   0xf   : > { %p203_p10 = pnand %p1304_p6, %p202_p9 }
  0x10   : > { %v1540_v0 = vld [vmem:[%s2243_s1] sm:$0xff] (!%p203_p10)   ;;  %s1307_s5 = sshll.u32 (!%p203_p10), %s1661_s18, 5  ;;  %v1541_v1 = vld [vmem:[%s2243_s1 + $0x8] sm:$0xff] (!%p203_p10)   ;;  %vm272_vm0 = vcmask (!%p203_p10), 64512   ;;  %v1542_v2 = vld [vmem:[%s2243_s1 + $0x10] sm:$0xff] (!%p203_p10)   ;;  %v1671_v3 = vmov (!%p203_p10), 0.0  }
  0x11   : > { %206 = sbr.rel (%p203_p10) target bundleno = 370 (0x172), region = 28  ;;  %p247_p11 = scmp.lt.s32.totalorder (!%p203_p10), %s1307_s5, 63  ;;  %1435 = vmatprep.subr.bf16.mxu0 (!%p203_p10), %v1540_v0  ;;  %1473 = vmatprep.subr.bf16.mxu1 (!%p203_p10), %v1540_v0  ;;  %275 = vst.msk [vmem:[#allocation2 + $0x10] sm:$0xff] (!%p203_p10), %vm272_vm0, %v1671_v3  ;;  %273 = vst.msk [vmem:[#allocation2] sm:$0xff] (!%p203_p10), %vm272_vm0, %v1671_v3  ;;  %vm473_vm1 = vcmask (!%p203_p10), 392192   ;;  %vm911_vm2 = vcmask (!%p203_p10), 60416  }
  0x12   : > { %1436 = vmatpush3.bf16.msra.mxu0 (!%p203_p10), %v1540_v0  ;;  %1476 = vmatpush3.bf16.msra.mxu1 (!%p203_p10), %v1540_v0  ;;  %274 = vst.msk [vmem:[#allocation2 + $0x8] sm:$0xff] (!%p203_p10), %vm272_vm0, %v1671_v3  ;;  %276 = vst.msk [vmem:[#allocation2 + $0x18] sm:$0xff] (!%p203_p10), %vm272_vm0, %v1671_v3  ;;  %s2151_s24 = sand.u32 (!%p203_p10), 1, %s1653_s16   ;;  %s1380_s29 = sshll.u32 (!%p203_p10), %s1661_s18, 7 }
  0x13   : > { %1437 = vmatprep.subr.bf16.mxu0 (!%p203_p10), %v1541_v1  ;;  %1474 = vmatprep.subr.bf16.mxu1 (!%p203_p10), %v1541_v1  ;;  %277 = vst.msk [vmem:[#allocation2 + $0x20] sm:$0xff] (!%p203_p10), %vm272_vm0, %v1671_v3  ;;  %278 = vst.msk [vmem:[#allocation2 + $0x28] sm:$0xff] (!%p203_p10), %vm272_vm0, %v1671_v3  ;;  %s1305_s26 = sshll.u32 (!%p203_p10), %s2151_s24, 3  ;;  %s2170_s12 = scalar_lea.hbm (!%p203_p10), %s2246_s4, %s1380_s29 }
  0x14   : > { %279 = vst.msk [vmem:[#allocation2 + $0x30] sm:$0xff] (!%p203_p10), %vm272_vm0, %v1671_v3  ;;  %280 = vst.msk [vmem:[#allocation2 + $0x38] sm:$0xff] (!%p203_p10), %vm272_vm0, %v1671_v3  ;;  %s238_s30 = scalar_lea.vmem (!%p203_p10), [#allocation3], %s1305_s26  ;;  %s2156_s6 = scalar_lea.vmem (!%p203_p10), [#allocation5], %s1305_s26 }
  0x15   : > { %281 = vst.msk [vmem:[#allocation2 + $0x40] sm:$0xff] (!%p203_p10), %vm272_vm0, %v1671_v3  ;;  %282 = vst.msk [vmem:[#allocation2 + $0x48] sm:$0xff] (!%p203_p10), %vm272_vm0, %v1671_v3  ;;  %s1157_s7 = sshll.u32 (!%p203_p10), %s2156_s6, 4  ;;  %s1672_s21 = smov (!%p203_p10), [#allocation3]   ;;  %s2172_s7 = int_to_ptr.vmem [resolvable:$true] %s1157_s7 }
  0x16   : > { %283 = vst.msk [vmem:[#allocation2 + $0x50] sm:$0xff] (!%p203_p10), %vm272_vm0, %v1671_v3  ;;  %284 = vst.msk [vmem:[#allocation2 + $0x58] sm:$0xff] (!%p203_p10), %vm272_vm0, %v1671_v3  ;;  %1438 = vmatpush3.bf16.msra.mxu0 (!%p203_p10), %v1541_v1  ;;  %1477 = vmatpush3.bf16.msra.mxu1 (!%p203_p10), %v1541_v1 }
  0x17   : > { %285 = vst.msk [vmem:[#allocation2 + $0x60] sm:$0xff] (!%p203_p10), %vm272_vm0, %v1671_v3  ;;  %286 = vst.msk [vmem:[#allocation2 + $0x68] sm:$0xff] (!%p203_p10), %vm272_vm0, %v1671_v3  ;;  %1439 = vmatprep.subr.bf16.mxu0 (!%p203_p10), %v1542_v2  ;;  %1475 = vmatprep.subr.bf16.mxu1 (!%p203_p10), %v1542_v2 }
  0x18   : > { %s2257_s5 = smov (!%p247_p11, %s1307_s5), 63  ;;  %287 = vst.msk [vmem:[#allocation2 + $0x70] sm:$0xff] %vm272_vm0, %v1671_v3  ;;  %288 = vst.msk [vmem:[#allocation2 + $0x78] sm:$0xff] %vm272_vm0, %v1671_v3  ;;  %v313_v20 = vld [vmem:[#allocation2 + $0x10] sm:$0xff]  ;;  %v311_v21 = vld [vmem:[#allocation2] sm:$0xff] }
  0x19   : > { %289 = vst.msk [vmem:[#allocation2 + $0x80] sm:$0xff] %vm272_vm0, %v1671_v3  ;;  %290 = vst.msk [vmem:[#allocation2 + $0x88] sm:$0xff] %vm272_vm0, %v1671_v3  ;;  %s1308_s10 = sshll.u32 %s2257_s5, 2  ;;  %v314_v23 = vld [vmem:[#allocation2 + $0x18] sm:$0xff]  ;;  %v312_v26 = vld [vmem:[#allocation2 + $0x8] sm:$0xff]  ;;  %s1144_s5 = sshll.u32 %s238_s30, 4  ;;  %s2164_s5 = int_to_ptr.vmem [resolvable:$true] %s1144_s5 }
  0x1a   : > { %291 = vst.msk [vmem:[#allocation2 + $0x90] sm:$0xff] %vm272_vm0, %v1671_v3  ;;  %292 = vst.msk [vmem:[#allocation2 + $0x98] sm:$0xff] %vm272_vm0, %v1671_v3  ;;  %s1804_s13 = scalar_lea.vmem %s2242_s0, %s1308_s10  ;;  %1440 = vmatpush3.bf16.msra.mxu0 %v1542_v2  ;;  %1478 = vmatpush3.bf16.msra.mxu1 %v1542_v2  ;;  %v315_v42 = vld [vmem:[#allocation2 + $0x20] sm:$0xff]  ;;  %v316_v50 = vld [vmem:[#allocation2 + $0x28] sm:$0xff]  ;;  %s1850_s22 = scalar_lea.vmem %s2244_s2, %s1308_s10 }
  0x1b   : > { %293 = vst.msk [vmem:[#allocation2 + $0xa0] sm:$0xff] %vm272_vm0, %v1671_v3  ;;  %294 = vst.msk [vmem:[#allocation2 + $0xa8] sm:$0xff] %vm272_vm0, %v1671_v3  ;;  %v1543_v4 = vld [vmem:[%s1804_s13] sm:$0xff]   ;;  %v1544_v5 = vld [vmem:[%s1804_s13 + $0x8] sm:$0xff]   ;;  %s2162_s10 = scalar_lea.hbm %s2245_s3, %s1380_s29  ;;  %s1559_s14 = scalar_lea.vmem %s2164_s5, 128 }
  0x1c   : > { %295 = vst.msk [vmem:[#allocation2 + $0xb0] sm:$0xff] %vm272_vm0, %v1671_v3  ;;  %296 = vst.msk [vmem:[#allocation2 + $0xb8] sm:$0xff] %vm272_vm0, %v1671_v3  ;;  %1441 = vmatprep.mubr.msk.bf16.mxu0 %vm473_vm1, %v1543_v4  ;;  %v1545_v6 = vld [vmem:[%s1804_s13 + $0x10] sm:$0xff]   ;;  %v1551_v7 = vld [vmem:[%s1804_s13 + $0x40] sm:$0xff]   ;;  %p1560_p12 = scmp.ne.s32.totalorder %s2164_s5, %s1559_s14 }
  0x1d   : > { %297 = vst.msk [vmem:[#allocation2 + $0xc0] sm:$0xff] %vm272_vm0, %v1671_v3  ;;  %298 = vst.msk [vmem:[#allocation2 + $0xc8] sm:$0xff] %vm272_vm0, %v1671_v3  ;;  %1442 = vmatmul.mubr.msk.bf16.vlgmr.msra.gmra.mrb[0].mxu0 %vm473_vm1, %v1544_v5  ;;  %v1552_v8 = vld [vmem:[%s1804_s13 + $0x48] sm:$0xff]   ;;  %1457 = vmatprep.mubr.msk.bf16.mxu1 %vm473_vm1, %v1551_v7  ;;  %v1553_v9 = vld [vmem:[%s1804_s13 + $0x50] sm:$0xff]  }
  0x1e   : > { %299 = vst.msk [vmem:[#allocation2 + $0xd0] sm:$0xff] %vm272_vm0, %v1671_v3  ;;  %300 = vst.msk [vmem:[#allocation2 + $0xd8] sm:$0xff] %vm272_vm0, %v1671_v3  ;;  %1445 = vmatprep.mubr.msk.bf16.mxu0 %vm473_vm1, %v1545_v6  ;;  %v1546_v10 = vld [vmem:[%s1804_s13 + $0x18] sm:$0xff]   ;;  %1458 = vmatmul.mubr.msk.bf16.vlgmr.msra.gmra.mrb[0].mxu1 %vm473_vm1, %v1552_v8  ;;  %v1547_v11 = vld [vmem:[%s1804_s13 + $0x20] sm:$0xff]   ;;  %p1561_p13 = pnand %p1560_p12, %p1739_p4 }
  0x1f   : > { %301 = vst.msk [vmem:[#allocation2 + $0xe0] sm:$0xff] %vm272_vm0, %v1671_v3  ;;  %302 = vst.msk [vmem:[#allocation2 + $0xe8] sm:$0xff] %vm272_vm0, %v1671_v3  ;;  %1461 = vmatprep.mubr.msk.bf16.mxu1 %vm473_vm1, %v1553_v9  ;;  %v1554_v12 = vld [vmem:[%s1804_s13 + $0x58] sm:$0xff]   ;;  %v1555_v13 = vld [vmem:[%s1804_s13 + $0x60] sm:$0xff]  }
  0x20   : > { %303 = vst.msk [vmem:[#allocation2 + $0xf0] sm:$0xff] %vm272_vm0, %v1671_v3  ;;  %304 = vst.msk [vmem:[#allocation2 + $0xf8] sm:$0xff] %vm272_vm0, %v1671_v3  ;;  %v1548_v14 = vld [vmem:[%s1804_s13 + $0x28] sm:$0xff]   ;;  %v1549_v15 = vld [vmem:[%s1804_s13 + $0x30] sm:$0xff]   ;;  %p1562_p0 = pneg %p1561_p13 }
  0x21   : > { %v1556_v16 = vld [vmem:[%s1804_s13 + $0x68] sm:$0xff]   ;;  %v1557_v17 = vld [vmem:[%s1804_s13 + $0x70] sm:$0xff]   ;;  %v1550_v18 = vld [vmem:[%s1804_s13 + $0x38] sm:$0xff]  }
  0x22   : > { %v1558_v19 = vld [vmem:[%s1804_s13 + $0x78] sm:$0xff]   ;;  %v329_v29 = vld [vmem:[#allocation2 + $0x90] sm:$0xff]  ;;  %v327_v32 = vld [vmem:[#allocation2 + $0x80] sm:$0xff]  ;;  %s1122_s13 = scalar_lea.sflag [#allocation4], %s2151_s24 }
  0x23   : > { %v330_v35 = vld [vmem:[#allocation2 + $0x98] sm:$0xff]  ;;  %v328_v38 = vld [vmem:[#allocation2 + $0x88] sm:$0xff]  ;;  %v317_v39 = vld [vmem:[#allocation2 + $0x30] sm:$0xff] }
  0x24   : > { %v318_v46 = vld [vmem:[#allocation2 + $0x38] sm:$0xff]  ;;  %v321_v7 = vld [vmem:[#allocation2 + $0x50] sm:$0xff] }
  0x25   : > { %1446 = vmatmul.mubr.msk.bf16.gmra.mrb[4].mxu0 %vm473_vm1, %v1546_v10 }
  0x26   : > { %1449 = vmatprep.mubr.msk.bf16.mxu0 %vm473_vm1, %v1547_v11  ;;  %1462 = vmatmul.mubr.msk.bf16.gmra.mrb[4].mxu1 %vm473_vm1, %v1554_v12  ;;  %v319_v12 = vld [vmem:[#allocation2 + $0x40] sm:$0xff] }
  0x27   : > { %1465 = vmatprep.mubr.msk.bf16.mxu1 %vm473_vm1, %v1555_v13 }
  0x2d   : > { %1450 = vmatmul.mubr.msk.bf16.gmra.mrb[8].mxu0 %vm473_vm1, %v1548_v14 }
  0x2e   : > { %1453 = vmatprep.mubr.msk.bf16.mxu0 %vm473_vm1, %v1549_v15  ;;  %1466 = vmatmul.mubr.msk.bf16.gmra.mrb[8].mxu1 %vm473_vm1, %v1556_v16 }
  0x2f   : > { %1469 = vmatprep.mubr.msk.bf16.mxu1 %vm473_vm1, %v1557_v17 }
  0x35   : > { %1454 = vmatmul.mubr.msk.bf16.gmra.mrb[12].mxu0 %vm473_vm1, %v1550_v18 }
  0x36   : > { %1470 = vmatmul.mubr.msk.bf16.gmra.mrb[12].mxu1 %vm473_vm1, %v1558_v19 }
  0xf0   : > { %v1443_v22 = vpop.f32.mrb[0].mxu0 }
  0xf1   : > { %v685_v24 = vadd.f32 %v1443_v22, %v313_v20  ;;  %v556_v25 = vpop.f32.mrb[1].mxu0  ;;  %v1459_v34 = vpop.f32.mrb[0].mxu1 }
  0xf2   : > { %v683_v27 = vadd.f32 %v556_v25, %v311_v21  ;;  %v1444_v28 = vpop.f32.mrb[2].mxu0  ;;  %v701_v36 = vadd.f32 %v1459_v34, %v329_v29  ;;  %v620_v37 = vpop.f32.mrb[1].mxu1 }
  0xf3   : > { %718 = vst.msk [vmem:[#allocation2 + $0x10] sm:$0xff] %vm272_vm0, %v685_v24  ;;  %v686_v30 = vadd.f32 %v1444_v28, %v314_v23  ;;  %v559_v31 = vpop.f32.mrb[3].mxu0  ;;  %v699_v40 = vadd.f32 %v620_v37, %v327_v32  ;;  %v1460_v41 = vpop.f32.mrb[2].mxu1 }
  0xf4   : > { %716 = vst.msk [vmem:[#allocation2] sm:$0xff] %vm272_vm0, %v683_v27  ;;  %v684_v33 = vadd.f32 %v559_v31, %v312_v26  ;;  %734 = vst.msk [vmem:[#allocation2 + $0x90] sm:$0xff] %vm272_vm0, %v701_v36  ;;  %v702_v43 = vadd.f32 %v1460_v41, %v330_v35  ;;  %v623_v44 = vpop.f32.mrb[3].mxu1 }
  0xf5   : > { %719 = vst.msk [vmem:[#allocation2 + $0x18] sm:$0xff] %vm272_vm0, %v686_v30  ;;  %732 = vst.msk [vmem:[#allocation2 + $0x80] sm:$0xff] %vm272_vm0, %v699_v40  ;;  %v700_v47 = vadd.f32 %v623_v44, %v328_v38  ;;  %v322_v44 = vld [vmem:[#allocation2 + $0x58] sm:$0xff] }
  0xf6   : > { %717 = vst.msk [vmem:[#allocation2 + $0x8] sm:$0xff] %vm272_vm0, %v684_v33  ;;  %735 = vst.msk [vmem:[#allocation2 + $0x98] sm:$0xff] %vm272_vm0, %v702_v43 }
  0xf7   : > { %733 = vst.msk [vmem:[#allocation2 + $0x88] sm:$0xff] %vm272_vm0, %v700_v47 }
  0xf8   : > { %v1447_v45 = vpop.f32.mrb[4].mxu0 }
  0xf9   : > { %v689_v48 = vadd.f32 %v1447_v45, %v317_v39  ;;  %v572_v49 = vpop.f32.mrb[5].mxu0  ;;  %v1855_v62 = vpop.f32.mrb[4].mxu1 }
  0xfa   : > { %v753_v51 = vld [vmem:[#allocation2 + $0x10] sm:$0xff]  ;;  %v687_v52 = vadd.f32 %v572_v49, %v315_v42  ;;  %v1448_v53 = vpop.f32.mrb[6].mxu0  ;;  %v1860_v2 = vpop.f32.mrb[5].mxu1  ;;  %v320_v49 = vld [vmem:[#allocation2 + $0x48] sm:$0xff] }
  0xfb   : > { %v1386_v54 = vpack.c.bf16 %v753_v51, %v753_v51  ;;  %v751_v55 = vld [vmem:[#allocation2] sm:$0xff]  ;;  %722 = vst.msk [vmem:[#allocation2 + $0x30] sm:$0xff] %vm272_vm0, %v689_v48  ;;  %v690_v56 = vadd.f32 %v1448_v53, %v318_v46  ;;  %v575_v57 = vpop.f32.mrb[7].mxu0  ;;  %v1015_v63 = vmul.f32 %v753_v51, %v753_v51  ;;  %v1867_v8 = vld [vmem:[#allocation2 + $0x90] sm:$0xff]  ;;  %v1869_v9 = vpop.f32.mrb[6].mxu1  ;;  %v947_v16 = vsel %vm272_vm0, %v753_v51, 0.0 }
  0xfc   : > { %v1384_v58 = vpack.c.bf16 %v751_v55, %v751_v55  ;;  %v1013_v59 = vmul.f32 %v751_v55, %v751_v55  ;;  %v754_v60 = vld [vmem:[#allocation2 + $0x18] sm:$0xff]  ;;  %720 = vst.msk [vmem:[#allocation2 + $0x20] sm:$0xff] %vm272_vm0, %v687_v52  ;;  %v688_v61 = vadd.f32 %v575_v57, %v316_v50  ;;  %v944_v3 = vsel %vm272_vm0, %v751_v55, 0.0  ;;  %v1875_v14 = vld [vmem:[#allocation2 + $0x80] sm:$0xff]  ;;  %v1877_v15 = vpop.f32.mrb[7].mxu1  ;;  %v325_v55 = vld [vmem:[#allocation2 + $0x70] sm:$0xff] }
  0xfd   : > { %914 = vst.msk [vmem:[%s1850_s22 + $0x8] sm:$0xf] %vm911_vm2, %v1386_v54  ;;  %v1387_v0 = vpack.c.bf16 %v754_v60, %v754_v60  ;;  %v752_v1 = vld [vmem:[#allocation2 + $0x8] sm:$0xff]  ;;  %v1016_v10 = vmul.f32 %v754_v60, %v754_v60  ;;  %v1402_v13 = vpack.c.bf16 %v1867_v8, %v1867_v8  ;;  %v1400_v20 = vpack.c.bf16 %v1875_v14, %v1875_v14  ;;  %v1886_v21 = vld [vmem:[#allocation2 + $0x98] sm:$0xff] }
  0xfe   : > { %723 = vst.msk [vmem:[#allocation2 + $0x38] sm:$0xff] %vm272_vm0, %v690_v56  ;;  %v1385_v4 = vpack.c.bf16 %v752_v1, %v752_v1  ;;  %v945_v5 = vsel %vm272_vm0, %v752_v1, 0.0  ;;  %v1014_v6 = vmul.f32 %v752_v1, %v752_v1  ;;  %721 = vst.msk [vmem:[#allocation2 + $0x28] sm:$0xff] %vm272_vm0, %v688_v61  ;;  %v1045_v17 = vsel %vm272_vm0, %v1013_v59, 0.0  ;;  %v1890_v26 = vld [vmem:[#allocation2 + $0x88] sm:$0xff]  ;;  %v323_v61 = vld [vmem:[#allocation2 + $0x60] sm:$0xff] }
  0xff   : > { %912 = vst.msk [vmem:[%s1850_s22] sm:$0xf] %vm911_vm2, %v1384_v58  ;;  %915 = vst.msk [vmem:[%s1850_s22 + $0xc] sm:$0xf] %vm911_vm2, %v1387_v0  ;;  %v946_v11 = vadd.f32 %v945_v5, %v944_v3  ;;  %v1048_v27 = vsel %vm272_vm0, %v1015_v63, 0.0  ;;  %v1403_v31 = vpack.c.bf16 %v1886_v21, %v1886_v21  ;;  %v1401_v32 = vpack.c.bf16 %v1890_v26, %v1890_v26  ;;  %v333_v63 = vld [vmem:[#allocation2 + $0xb0] sm:$0xff] }
 0x100   : > { %913 = vst.msk [vmem:[%s1850_s22 + $0x4] sm:$0xf] %vm911_vm2, %v1385_v4  ;;  %v1046_v18 = vsel %vm272_vm0, %v1014_v6, 0.0  ;;  %v1451_v19 = vpop.f32.mrb[8].mxu0  ;;  %930 = vst.msk [vmem:[%s1850_s22 + $0x48] sm:$0xf] %vm911_vm2, %v1402_v13 }
 0x101   : > { %v948_v22 = vadd.f32 %v947_v16, %v946_v11  ;;  %v1047_v23 = vadd.f32 %v1046_v18, %v1045_v17  ;;  %v693_v24 = vadd.f32 %v1451_v19, %v321_v7  ;;  %v588_v25 = vpop.f32.mrb[9].mxu0  ;;  %928 = vst.msk [vmem:[%s1850_s22 + $0x40] sm:$0xf] %vm911_vm2, %v1400_v20  ;;  %v949_v33 = vsel %vm272_vm0, %v754_v60, 0.0  ;;  %931 = vst.msk [vmem:[%s1850_s22 + $0x4c] sm:$0xf] %vm911_vm2, %v1403_v31 }
 0x102   : > { %v757_v28 = vld [vmem:[#allocation2 + $0x30] sm:$0xff]  ;;  %v691_v29 = vadd.f32 %v588_v25, %v319_v12  ;;  %v1452_v30 = vpop.f32.mrb[10].mxu0  ;;  %v1050_v34 = vsel %vm272_vm0, %v1016_v10, 0.0  ;;  %929 = vst.msk [vmem:[%s1850_s22 + $0x44] sm:$0xf] %vm911_vm2, %v1401_v32  ;;  %v1908_v45 = vpop.f32.mrb[8].mxu1 }
 0x103   : > { %v1049_v35 = vadd.f32 %v1048_v27, %v1047_v23  ;;  %v1390_v36 = vpack.c.bf16 %v757_v28, %v757_v28  ;;  %v755_v37 = vld [vmem:[#allocation2 + $0x20] sm:$0xff]  ;;  %726 = vst.msk [vmem:[#allocation2 + $0x50] sm:$0xff] %vm272_vm0, %v693_v24  ;;  %v591_v38 = vpop.f32.mrb[11].mxu0  ;;  %v950_v40 = vadd.f32 %v949_v33, %v948_v22  ;;  %v1912_v50 = vpop.f32.mrb[9].mxu1  ;;  %v1019_v51 = vmul.f32 %v757_v28, %v757_v28  ;;  %v326_v5 = vld [vmem:[#allocation2 + $0x78] sm:$0xff]  ;;  %v324_v20 = vld [vmem:[#allocation2 + $0x68] sm:$0xff] }
 0x104   : > { %v1388_v39 = vpack.c.bf16 %v755_v37, %v755_v37  ;;  %v951_v41 = vsel %vm272_vm0, %v755_v37, 0.0  ;;  %v1017_v42 = vmul.f32 %v755_v37, %v755_v37  ;;  %724 = vst.msk [vmem:[#allocation2 + $0x40] sm:$0xff] %vm272_vm0, %v691_v29  ;;  %v1917_v56 = vpop.f32.mrb[10].mxu1  ;;  %v694_v60 = vadd.f32 %v1452_v30, %v322_v44  ;;  %v331_v30 = vld [vmem:[#allocation2 + $0xa0] sm:$0xff]  ;;  %v334_v31 = vld [vmem:[#allocation2 + $0xb8] sm:$0xff]  ;;  %v341_v44 = vld [vmem:[#allocation2 + $0xf0] sm:$0xff] }
 0x105   : > { %v758_v43 = vld [vmem:[#allocation2 + $0x38] sm:$0xff]  ;;  %918 = vst.msk [vmem:[%s1850_s22 + $0x18] sm:$0xf] %vm911_vm2, %v1390_v36  ;;  %v1051_v46 = vadd.f32 %v1050_v34, %v1049_v35  ;;  %v756_v48 = vld [vmem:[#allocation2 + $0x28] sm:$0xff]  ;;  %v952_v52 = vadd.f32 %v951_v41, %v950_v40  ;;  %v1922_v0 = vpop.f32.mrb[11].mxu1  ;;  %v692_v3 = vadd.f32 %v591_v38, %v320_v49  ;;  %v955_v6 = vsel %vm272_vm0, %v757_v28, 0.0 }
 0x106   : > { %v1391_v47 = vpack.c.bf16 %v758_v43, %v758_v43  ;;  %916 = vst.msk [vmem:[%s1850_s22 + $0x10] sm:$0xf] %vm911_vm2, %v1388_v39  ;;  %v1052_v53 = vsel %vm272_vm0, %v1017_v42, 0.0  ;;  %v1389_v54 = vpack.c.bf16 %v756_v48, %v756_v48  ;;  %v953_v58 = vsel %vm272_vm0, %v756_v48, 0.0  ;;  %v332_v35 = vld [vmem:[#allocation2 + $0xa8] sm:$0xff]  ;;  %v337_v36 = vld [vmem:[#allocation2 + $0xd0] sm:$0xff] }
 0x107   : > { %v1053_v57 = vadd.f32 %v1052_v53, %v1051_v46  ;;  %v1018_v59 = vmul.f32 %v756_v48, %v756_v48  ;;  %v954_v1 = vadd.f32 %v953_v58, %v952_v52  ;;  %v1020_v7 = vmul.f32 %v758_v43, %v758_v43  ;;  %727 = vst.msk [vmem:[#allocation2 + $0x58] sm:$0xff] %vm272_vm0, %v694_v60  ;;  %v335_v37 = vld [vmem:[#allocation2 + $0xc0] sm:$0xff]  ;;  %v338_v42 = vld [vmem:[#allocation2 + $0xd8] sm:$0xff] }
 0x108   : > { %919 = vst.msk [vmem:[%s1850_s22 + $0x1c] sm:$0xf] %vm911_vm2, %v1391_v47  ;;  %917 = vst.msk [vmem:[%s1850_s22 + $0x14] sm:$0xf] %vm911_vm2, %v1389_v54  ;;  %v1455_v4 = vpop.f32.mrb[12].mxu0  ;;  %v705_v22 = vadd.f32 %v1855_v62, %v333_v63  ;;  %v1056_v23 = vsel %vm272_vm0, %v1019_v51, 0.0  ;;  %v703_v49 = vadd.f32 %v1860_v2, %v331_v30  ;;  %v706_v51 = vadd.f32 %v1869_v9, %v334_v31 }
 0x109   : > { %v1054_v10 = vsel %vm272_vm0, %v1018_v59, 0.0  ;;  %v697_v11 = vadd.f32 %v1455_v4, %v325_v55  ;;  %v604_v12 = vpop.f32.mrb[13].mxu0  ;;  %v956_v13 = vadd.f32 %v955_v6, %v954_v1  ;;  %725 = vst.msk [vmem:[#allocation2 + $0x48] sm:$0xff] %vm272_vm0, %v692_v3  ;;  %v957_v24 = vsel %vm272_vm0, %v758_v43, 0.0  ;;  %v1471_v38 = vpop.f32.mrb[12].mxu1  ;;  %v336_v43 = vld [vmem:[#allocation2 + $0xc8] sm:$0xff] }
 0x10a   : > { %v1055_v16 = vadd.f32 %v1054_v10, %v1053_v57  ;;  %v1929_v17 = vld [vmem:[#allocation2 + $0x50] sm:$0xff]  ;;  %v695_v18 = vadd.f32 %v604_v12, %v323_v61  ;;  %v1456_v19 = vpop.f32.mrb[14].mxu0  ;;  %738 = vst.msk [vmem:[#allocation2 + $0xb0] sm:$0xff] %vm272_vm0, %v705_v22  ;;  %v1058_v39 = vsel %vm272_vm0, %v1020_v7, 0.0  ;;  %v668_v46 = vpop.f32.mrb[13].mxu1  ;;  %v339_v52 = vld [vmem:[#allocation2 + $0xe0] sm:$0xff]  ;;  %v704_v55 = vadd.f32 %v1877_v15, %v332_v35 }
 0x10b   : > { %v1394_v25 = vpack.c.bf16 %v1929_v17, %v1929_v17  ;;  %v759_v27 = vld [vmem:[#allocation2 + $0x40] sm:$0xff]  ;;  %730 = vst.msk [vmem:[#allocation2 + $0x70] sm:$0xff] %vm272_vm0, %v697_v11  ;;  %v698_v28 = vadd.f32 %v1456_v19, %v326_v5  ;;  %v607_v29 = vpop.f32.mrb[15].mxu0  ;;  %v958_v34 = vadd.f32 %v957_v24, %v956_v13  ;;  %v1472_v53 = vpop.f32.mrb[14].mxu1  ;;  %v709_v57 = vadd.f32 %v1908_v45, %v337_v36  ;;  %v342_v59 = vld [vmem:[#allocation2 + $0xf8] sm:$0xff] }
 0x10c   : > { %v1057_v32 = vadd.f32 %v1056_v23, %v1055_v16  ;;  %v1392_v33 = vpack.c.bf16 %v759_v27, %v759_v27  ;;  %v959_v62 = vsel %vm272_vm0, %v759_v27, 0.0  ;;  %728 = vst.msk [vmem:[#allocation2 + $0x60] sm:$0xff] %vm272_vm0, %v695_v18  ;;  %v1021_v40 = vmul.f32 %v759_v27, %v759_v27  ;;  %v671_v60 = vpop.f32.mrb[15].mxu1  ;;  %736 = vst.msk [vmem:[#allocation2 + $0xa0] sm:$0xff] %vm272_vm0, %v703_v49  ;;  %v340_v18 = vld [vmem:[#allocation2 + $0xe8] sm:$0xff] }
 0x10d   : > { %922 = vst.msk [vmem:[%s1850_s22 + $0x28] sm:$0xf] %vm911_vm2, %v1394_v25  ;;  %v696_v41 = vadd.f32 %v607_v29, %v324_v20  ;;  %v960_v47 = vadd.f32 %v959_v62, %v958_v34  ;;  %v707_v58 = vadd.f32 %v1912_v50, %v335_v37  ;;  %v1023_v61 = vmul.f32 %v1929_v17, %v1929_v17 }
 0x10e   : > { %731 = vst.msk [vmem:[#allocation2 + $0x78] sm:$0xff] %vm272_vm0, %v698_v28  ;;  %v1059_v48 = vadd.f32 %v1058_v39, %v1057_v32  ;;  %v1060_v54 = vsel %vm272_vm0, %v1021_v40, 0.0  ;;  %v762_v2 = vld [vmem:[#allocation2 + $0x58] sm:$0xff]  ;;  %739 = vst.msk [vmem:[#allocation2 + $0xb8] sm:$0xff] %vm272_vm0, %v706_v51  ;;  %v710_v9 = vadd.f32 %v1917_v56, %v338_v42  ;;  %v708_v63 = vadd.f32 %v1922_v0, %v336_v43 }
 0x10f   : > { %920 = vst.msk [vmem:[%s1850_s22 + $0x20] sm:$0xf] %vm911_vm2, %v1392_v33  ;;  %v713_v1 = vadd.f32 %v1471_v38, %v341_v44  ;;  %v1395_v3 = vpack.c.bf16 %v762_v2, %v762_v2  ;;  %v1024_v45 = vmul.f32 %v762_v2, %v762_v2  ;;  %v711_v4 = vadd.f32 %v668_v46, %v339_v52 }
 0x110   : > { %729 = vst.msk [vmem:[#allocation2 + $0x68] sm:$0xff] %vm272_vm0, %v696_v41  ;;  %v1061_v15 = vadd.f32 %v1060_v54, %v1059_v48  ;;  %v760_v50 = vld [vmem:[#allocation2 + $0x48] sm:$0xff]  ;;  %737 = vst.msk [vmem:[#allocation2 + $0xa8] sm:$0xff] %vm272_vm0, %v704_v55  ;;  %v714_v0 = vadd.f32 %v1472_v53, %v342_v59  ;;  %v963_v10 = vsel %vm272_vm0, %v1929_v17, 0.0  ;;  %v1973_v16 = vmul.f32 %v1875_v14, %v1875_v14 }
 0x111   : > { %742 = vst.msk [vmem:[#allocation2 + $0xd0] sm:$0xff] %vm272_vm0, %v709_v57  ;;  %740 = vst.msk [vmem:[#allocation2 + $0xc0] sm:$0xff] %vm272_vm0, %v707_v58  ;;  %v1393_v5 = vpack.c.bf16 %v760_v50, %v760_v50  ;;  %v961_v6 = vsel %vm272_vm0, %v760_v50, 0.0  ;;  %v1022_v7 = vmul.f32 %v760_v50, %v760_v50  ;;  %v1064_v19 = vsel %vm272_vm0, %v1023_v61, 0.0  ;;  %v1989_v34 = vld [vmem:[#allocation2 + $0xb0] sm:$0xff] }
 0x112   : > { %v765_v56 = vld [vmem:[#allocation2 + $0x70] sm:$0xff]  ;;  %743 = vst.msk [vmem:[#allocation2 + $0xd8] sm:$0xff] %vm272_vm0, %v710_v9  ;;  %741 = vst.msk [vmem:[#allocation2 + $0xc8] sm:$0xff] %vm272_vm0, %v708_v63  ;;  %v962_v11 = vadd.f32 %v961_v6, %v960_v47  ;;  %v965_v20 = vsel %vm272_vm0, %v762_v2, 0.0  ;;  %v1066_v29 = vsel %vm272_vm0, %v1024_v45, 0.0  ;;  %v712_v33 = vadd.f32 %v671_v60, %v340_v18 }
 0x113   : > { %746 = vst.msk [vmem:[#allocation2 + $0xf0] sm:$0xff] %vm272_vm0, %v713_v1  ;;  %v1398_v12 = vpack.c.bf16 %v765_v56, %v765_v56  ;;  %v763_v13 = vld [vmem:[#allocation2 + $0x60] sm:$0xff]  ;;  %744 = vst.msk [vmem:[#allocation2 + $0xe0] sm:$0xff] %vm272_vm0, %v711_v4  ;;  %v1062_v17 = vsel %vm272_vm0, %v1022_v7, 0.0  ;;  %v971_v30 = vsel %vm272_vm0, %v765_v56, 0.0  ;;  %v1027_v35 = vmul.f32 %v765_v56, %v765_v56 }
 0x114   : > { %923 = vst.msk [vmem:[%s1850_s22 + $0x2c] sm:$0xf] %vm911_vm2, %v1395_v3  ;;  %921 = vst.msk [vmem:[%s1850_s22 + $0x24] sm:$0xf] %vm911_vm2, %v1393_v5  ;;  %v1396_v22 = vpack.c.bf16 %v763_v13, %v763_v13  ;;  %v964_v24 = vadd.f32 %v963_v10, %v962_v11  ;;  %v1063_v25 = vadd.f32 %v1062_v17, %v1061_v15  ;;  %v967_v31 = vsel %vm272_vm0, %v763_v13, 0.0  ;;  %v1993_v38 = vld [vmem:[#allocation2 + $0xa0] sm:$0xff] }
 0x115   : > { %v766_v23 = vld [vmem:[#allocation2 + $0x78] sm:$0xff]  ;;  %747 = vst.msk [vmem:[#allocation2 + $0xf8] sm:$0xff] %vm272_vm0, %v714_v0  ;;  %v1025_v27 = vmul.f32 %v763_v13, %v763_v13  ;;  %v1404_v43 = vpack.c.bf16 %v1993_v38, %v1993_v38  ;;  %745 = vst.msk [vmem:[#allocation2 + $0xe8] sm:$0xff] %vm272_vm0, %v712_v33  ;;  %v1406_v55 = vpack.c.bf16 %v1989_v34, %v1989_v34  ;;  %v1072_v7 = vsel %vm272_vm0, %v1027_v35, 0.0 }
 0x116   : > { %926 = vst.msk [vmem:[%s1850_s22 + $0x38] sm:$0xf] %vm911_vm2, %v1398_v12  ;;  %v1399_v28 = vpack.c.bf16 %v766_v23, %v766_v23  ;;  %924 = vst.msk [vmem:[%s1850_s22 + $0x30] sm:$0xf] %vm911_vm2, %v1396_v22  ;;  %v1065_v62 = vadd.f32 %v1064_v19, %v1063_v25  ;;  %v966_v36 = vadd.f32 %v965_v20, %v964_v24  ;;  %v1995_v39 = vld [vmem:[#allocation2 + $0xb8] sm:$0xff]  ;;  %v973_v56 = vsel %vm272_vm0, %v766_v23, 0.0 }
 0x117   : > { %v764_v32 = vld [vmem:[#allocation2 + $0x68] sm:$0xff]  ;;  %v1068_v40 = vsel %vm272_vm0, %v1025_v27, 0.0  ;;  %932 = vst.msk [vmem:[%s1850_s22 + $0x50] sm:$0xf] %vm911_vm2, %v1404_v43  ;;  %v1407_v59 = vpack.c.bf16 %v1995_v39, %v1995_v39  ;;  %934 = vst.msk [vmem:[%s1850_s22 + $0x58] sm:$0xf] %vm911_vm2, %v1406_v55  ;;  %v1028_v3 = vmul.f32 %v766_v23, %v766_v23  ;;  %v1030_v19 = vmul.f32 %v1890_v26, %v1890_v26 }
 0x118   : > { %927 = vst.msk [vmem:[%s1850_s22 + $0x3c] sm:$0xf] %vm911_vm2, %v1399_v28  ;;  %v1397_v37 = vpack.c.bf16 %v764_v32, %v764_v32  ;;  %v969_v41 = vsel %vm272_vm0, %v764_v32, 0.0  ;;  %v1026_v42 = vmul.f32 %v764_v32, %v764_v32  ;;  %v2002_v44 = vld [vmem:[#allocation2 + $0xa8] sm:$0xff]  ;;  %v2004_v46 = vld [vmem:[#allocation2 + $0xc0] sm:$0xff]  ;;  %v2006_v47 = vld [vmem:[#allocation2 + $0xd0] sm:$0xff]  ;;  %v968_v48 = vadd.f32 %v967_v31, %v966_v36 }
 0x119   : > { %v1067_v49 = vadd.f32 %v1066_v29, %v1065_v62  ;;  %v2010_v51 = vld [vmem:[#allocation2 + $0xc8] sm:$0xff]  ;;  %v2012_v52 = vld [vmem:[#allocation2 + $0xd8] sm:$0xff]  ;;  %v1405_v54 = vpack.c.bf16 %v2002_v44, %v2002_v44  ;;  %v1408_v60 = vpack.c.bf16 %v2004_v46, %v2004_v46  ;;  %v1410_v1 = vpack.c.bf16 %v2006_v47, %v2006_v47  ;;  %935 = vst.msk [vmem:[%s1850_s22 + $0x5c] sm:$0xf] %vm911_vm2, %v1407_v59 }
 0x11a   : > { %925 = vst.msk [vmem:[%s1850_s22 + $0x34] sm:$0xf] %vm911_vm2, %v1397_v37  ;;  %v2014_v53 = vld [vmem:[#allocation2 + $0xf0] sm:$0xff]  ;;  %v1070_v57 = vsel %vm272_vm0, %v1026_v42, 0.0  ;;  %v2023_v58 = vld [vmem:[#allocation2 + $0xe0] sm:$0xff]  ;;  %v1409_v61 = vpack.c.bf16 %v2010_v51, %v2010_v51  ;;  %v970_v9 = vadd.f32 %v969_v41, %v968_v48  ;;  %v1411_v15 = vpack.c.bf16 %v2012_v52, %v2012_v52 }
 0x11b   : > { %v1069_v2 = vadd.f32 %v1068_v40, %v1067_v49  ;;  %933 = vst.msk [vmem:[%s1850_s22 + $0x54] sm:$0xf] %vm911_vm2, %v1405_v54  ;;  %v1412_v45 = vpack.c.bf16 %v2023_v58, %v2023_v58  ;;  %v1414_v50 = vpack.c.bf16 %v2014_v53, %v2014_v53  ;;  %936 = vst.msk [vmem:[%s1850_s22 + $0x60] sm:$0xf] %vm911_vm2, %v1408_v60  ;;  %v975_v0 = vsel %vm272_vm0, %v1875_v14, 0.0 }
 0x11c   : > { %v2031_v63 = vld [vmem:[#allocation2 + $0xf8] sm:$0xff]  ;;  %937 = vst.msk [vmem:[%s1850_s22 + $0x64] sm:$0xf] %vm911_vm2, %v1409_v61  ;;  %v972_v5 = vadd.f32 %v971_v30, %v970_v9  ;;  %938 = vst.msk [vmem:[%s1850_s22 + $0x68] sm:$0xf] %vm911_vm2, %v1410_v1  ;;  %v2067_v12 = vld [vmem:[#allocation2 + $0xe8] sm:$0xff]  ;;  %v1031_v22 = vmul.f32 %v1867_v8, %v1867_v8  ;;  %v1032_v27 = vmul.f32 %v1886_v21, %v1886_v21 }
 0x11d   : > { %v1415_v4 = vpack.c.bf16 %v2031_v63, %v2031_v63  ;;  %v1071_v6 = vadd.f32 %v1070_v57, %v1069_v2  ;;  %939 = vst.msk [vmem:[%s1850_s22 + $0x6c] sm:$0xf] %vm911_vm2, %v1411_v15  ;;  %940 = vst.msk [vmem:[%s1850_s22 + $0x70] sm:$0xf] %vm911_vm2, %v1412_v45  ;;  %v1074_v13 = vsel %vm272_vm0, %v1028_v3, 0.0  ;;  %v1076_v18 = vsel %vm272_vm0, %v1973_v16, 0.0 }
 0x11e   : > { %942 = vst.msk [vmem:[%s1850_s22 + $0x78] sm:$0xf] %vm911_vm2, %v1414_v50  ;;  %v974_v11 = vadd.f32 %v973_v56, %v972_v5  ;;  %v1413_v14 = vpack.c.bf16 %v2067_v12, %v2067_v12  ;;  %v977_v23 = vsel %vm272_vm0, %v1890_v26, 0.0  ;;  %v979_v16 = vsel %vm272_vm0, %v1867_v8, 0.0 }
 0x11f   : > { %943 = vst.msk [vmem:[%s1850_s22 + $0x7c] sm:$0xf] %vm911_vm2, %v1415_v4  ;;  %v1073_v10 = vadd.f32 %v1072_v7, %v1071_v6  ;;  %v1078_v28 = vsel %vm272_vm0, %v1030_v19, 0.0  ;;  %v1033_v29 = vmul.f32 %v1993_v38, %v1993_v38  ;;  %v981_v26 = vsel %vm272_vm0, %v1886_v21, 0.0 }
 0x120   : > { %v976_v20 = vadd.f32 %v975_v0, %v974_v11  ;;  %941 = vst.msk [vmem:[%s1850_s22 + $0x74] sm:$0xf] %vm911_vm2, %v1413_v14  ;;  %v983_v32 = vsel %vm272_vm0, %v1993_v38, 0.0  ;;  %v1080_v33 = vsel %vm272_vm0, %v1031_v22, 0.0  ;;  %v1034_v35 = vmul.f32 %v2002_v44, %v2002_v44  ;;  %s1563_s22 = sshll.u32 %s1672_s21, 4  ;;  %s1564_s22 = int_to_ptr.vmem [resolvable:$false] %s1563_s22 }
 0x121   : > { %v1075_v17 = vadd.f32 %v1074_v13, %v1073_v10  ;;  %v1082_v36 = vsel %vm272_vm0, %v1032_v27, 0.0  ;;  %v1084_v37 = vsel %vm272_vm0, %v1033_v29, 0.0  ;;  %v985_v42 = vsel %vm272_vm0, %v2002_v44, 0.0  ;;  %s1565_s26 = scalar_lea.vmem %s1564_s22, 256  ;;  %p1566_p1 = scmp.lt.s32.totalorder %s2164_s5, %s1564_s22 }
 0x122   : > { %v978_v25 = vadd.f32 %v977_v23, %v976_v20  ;;  %v1035_v21 = vmul.f32 %v1989_v34, %v1989_v34  ;;  %v987_v48 = vsel %vm272_vm0, %v1989_v34, 0.0  ;;  %v1036_v49 = vmul.f32 %v1995_v39, %v1995_v39  ;;  %p1567_p2 = scmp.lt.s32.totalorder %s1565_s26, %s1559_s14 }
 0x123   : > { %v1077_v24 = vadd.f32 %v1076_v18, %v1075_v17  ;;  %v1037_v54 = vmul.f32 %v2004_v46, %v2004_v46  ;;  %v1086_v55 = vsel %vm272_vm0, %v1034_v35, 0.0  ;;  %v989_v44 = vsel %vm272_vm0, %v1995_v39, 0.0 }
 0x124   : > { %v980_v30 = vadd.f32 %v979_v16, %v978_v25  ;;  %v991_v60 = vsel %vm272_vm0, %v2004_v46, 0.0  ;;  %v1088_v61 = vsel %vm272_vm0, %v1035_v21, 0.0  ;;  %v1038_v9 = vmul.f32 %v2010_v51, %v2010_v51  ;;  %p1568_p3 = por %p1567_p2, %p1566_p1 }
 0x125   : > { %v1079_v31 = vadd.f32 %v1078_v28, %v1077_v24  ;;  %v1090_v1 = vsel %vm272_vm0, %v1036_v49, 0.0  ;;  %v1092_v15 = vsel %vm272_vm0, %v1037_v54, 0.0  ;;  %v993_v50 = vsel %vm272_vm0, %v2010_v51, 0.0 }
 0x126   : > { %v982_v62 = vadd.f32 %v981_v26, %v980_v30  ;;  %v1039_v39 = vmul.f32 %v2006_v47, %v2006_v47  ;;  %v995_v5 = vsel %vm272_vm0, %v2006_v47, 0.0  ;;  %v1040_v6 = vmul.f32 %v2012_v52, %v2012_v52  ;;  %p1569_p5 = pnand %p1568_p3, %p1562_p0 }
 0x127   : > { %v1081_v8 = vadd.f32 %v1080_v33, %v1079_v31  ;;  %v1041_v7 = vmul.f32 %v2023_v58, %v2023_v58  ;;  %v1094_v56 = vsel %vm272_vm0, %v1038_v9, 0.0  ;;  %v997_v51 = vsel %vm272_vm0, %v2012_v52, 0.0 }
 0x128   : > { %v984_v40 = vadd.f32 %v983_v32, %v982_v62  ;;  %v999_v11 = vsel %vm272_vm0, %v2023_v58, 0.0  ;;  %v1096_v13 = vsel %vm272_vm0, %v1039_v39, 0.0  ;;  %v1042_v19 = vmul.f32 %v2067_v12, %v2067_v12 }
 0x129   : > { %v1083_v41 = vadd.f32 %v1082_v36, %v1081_v8  ;;  %v1098_v14 = vsel %vm272_vm0, %v1040_v6, 0.0  ;;  %v1100_v20 = vsel %vm272_vm0, %v1041_v7, 0.0  ;;  %v1001_v52 = vsel %vm272_vm0, %v2067_v12, 0.0 }
 0x12a   : > { %v986_v38 = vadd.f32 %v985_v42, %v984_v40  ;;  %v1043_v58 = vmul.f32 %v2014_v53, %v2014_v53  ;;  %v1003_v25 = vsel %vm272_vm0, %v2014_v53, 0.0  ;;  %v1044_v16 = vmul.f32 %v2031_v63, %v2031_v63 }
 0x12b   : > { %v1085_v43 = vadd.f32 %v1084_v37, %v1083_v41  ;;  %v1102_v27 = vsel %vm272_vm0, %v1042_v19, 0.0  ;;  %v1005_v30 = vsel %vm272_vm0, %v2031_v63, 0.0 }
 0x12c   : > { %v988_v57 = vadd.f32 %v987_v48, %v986_v38  ;;  %v1104_v12 = vsel %vm272_vm0, %v1043_v58, 0.0  ;;  %v1106_v53 = vsel %vm272_vm0, %v1044_v16, 0.0 }
 0x12d   : > { %v1087_v59 = vadd.f32 %v1086_v55, %v1085_v43 }
 0x12e   : > { %v990_v2 = vadd.f32 %v989_v44, %v988_v57 }
 0x12f   : > { %v1089_v34 = vadd.f32 %v1088_v61, %v1087_v59 }
 0x130   : > { %v992_v3 = vadd.f32 %v991_v60, %v990_v2 }
 0x131   : > { %v1091_v45 = vadd.f32 %v1090_v1, %v1089_v34 }
 0x132   : > { %v994_v46 = vadd.f32 %v993_v50, %v992_v3 }
 0x133   : > { %v1093_v4 = vadd.f32 %v1092_v15, %v1091_v45 }
 0x134   : > { %v996_v0 = vadd.f32 %v995_v5, %v994_v46 }
 0x135   : > { %v1095_v10 = vadd.f32 %v1094_v56, %v1093_v4 }
 0x136   : > { %v998_v18 = vadd.f32 %v997_v51, %v996_v0 }
 0x137   : > { %v1097_v47 = vadd.f32 %v1096_v13, %v1095_v10 }
 0x138   : > { %v1000_v17 = vadd.f32 %v999_v11, %v998_v18 }
 0x139   : > { %v1099_v22 = vadd.f32 %v1098_v14, %v1097_v47 }
 0x13a   : > { %v1002_v23 = vadd.f32 %v1001_v52, %v1000_v17 }
 0x13b   : > { %v1101_v24 = vadd.f32 %v1100_v20, %v1099_v22 }
 0x13c   : > { %v1004_v28 = vadd.f32 %v1003_v25, %v1002_v23 }
 0x13d   : > { %v1103_v29 = vadd.f32 %v1102_v27, %v1101_v24 }
 0x13e   : > { %v1006_v31 = vadd.f32 %v1005_v30, %v1004_v28 }
 0x13f   : > { %v1105_v26 = vadd.f32 %v1104_v12, %v1103_v29 }
 0x140   : > { %v1007_v32 = vrot.slane %v1006_v31, 4 }
 0x141   : > { %v1107_v33 = vadd.f32 %v1106_v53, %v1105_v26 }
 0x142   : > { %v1008_v62 = vadd.f32 %v1007_v32, %v1006_v31 }
 0x143   : > { %v1108_v8 = vrot.slane %v1107_v33, 4 }
 0x144   : > { %v1009_v35 = vrot.slane %v1008_v62, 2 }
 0x145   : > { %v1109_v36 = vadd.f32 %v1108_v8, %v1107_v33 }
 0x146   : > { %v1010_v37 = vadd.f32 %v1009_v35, %v1008_v62 }
 0x147   : > { %v1110_v40 = vrot.slane %v1109_v36, 2 }
 0x148   : > { %v1011_v63 = vrot.slane %v1010_v37, 1 }
 0x149   : > { %v1111_v41 = vadd.f32 %v1110_v40, %v1109_v36 }
 0x14a   : > { %v1012_v42 = vadd.f32 %v1011_v63, %v1010_v37 }
 0x14b   : > { %v1112_v21 = vrot.slane %v1111_v41, 1 }
 0x14c   : > { %1114 = vst.msk [vmem:[%s238_s30] sm:$0xff] %vm272_vm0, %v1012_v42 }
 0x14d   : > { %v1113_v38 = vadd.f32 %v1112_v21, %v1111_v41 }
 0x14e   : > { %1572 = shalt.err (!%p1569_p5)
}
 0x14f   : > { %s1573_s29 = scalar_lea.hbm %s2162_s10, 128  ;;  %s1577_s9 = scalar_lea.hbm %s2245_s3, 256 }
 0x150   : > { %p1574_p6 = scmp.ne.s32.totalorder %s2162_s10, %s1573_s29  ;;  %p1578_p10 = scmp.lt.u32.totalorder %s2162_s10, %s2245_s3 }
 0x151   : > { %p1579_p11 = scmp.lt.u32.totalorder %s1577_s9, %s1573_s29  ;;  %p1581_p13 = scmp.lt.u32.totalorder %s1573_s29, %s2162_s10 }
 0x152   : > { %p1575_p7 = pnand %p1574_p6, %p1739_p4 }
 0x153   : > { %p1580_p12 = por %p1579_p11, %p1578_p10 }
 0x154   : > { %p1576_p9 = pneg %p1575_p7 }
 0x155   : > { %p1582_p0 = por %p1581_p13, %p1580_p12 }
 0x157   : > { %p1583_p1 = pnand %p1582_p0, %p1576_p9 }
 0x159   : > { %1586 = shalt.err (!%p1583_p1)
}
 0x15a   : > { %1479 = dma.vmem_to_hbm [thread:$0]  (%p1739_p4), %s2164_s5, 128, %s2162_s10, %s1122_s13   ;;  %1115 = vst.msk [vmem:[%s2156_s6] sm:$0xff] %vm272_vm0, %v1113_v38 }
 0x15b   : > { %s1127_s14 = scalar_lea.sflag [#allocation6], %s2151_s24  ;;  %s1587_s21 = scalar_lea.vmem %s2172_s7, 128 }
 0x15c   : > { %p1588_p2 = scmp.ne.s32.totalorder %s2172_s7, %s1587_s21  ;;  %s1673_s22 = smov [#allocation5]  }
 0x15d   : > { %s1591_s26 = sshll.u32 %s1673_s22, 4  ;;  %s1592_s26 = int_to_ptr.vmem [resolvable:$false] %s1591_s26 }
 0x15e   : > { %p1589_p3 = pnand %p1588_p2, %p1739_p4  ;;  %s1593_s29 = scalar_lea.vmem %s1592_s26, 256 }
 0x15f   : > { %p1594_p6 = scmp.lt.s32.totalorder %s2172_s7, %s1592_s26  ;;  %p1595_p7 = scmp.lt.s32.totalorder %s1593_s29, %s1587_s21 }
 0x160   : > { %p1590_p5 = pneg %p1589_p3 }
 0x161   : > { %p1596_p9 = por %p1595_p7, %p1594_p6 }
 0x163   : > { %p1597_p10 = pnand %p1596_p9, %p1590_p5 }
 0x165   : > { %1600 = shalt.err (!%p1597_p10)
}
 0x166   : > { %s1601_s24 = scalar_lea.hbm %s2170_s12, 128  ;;  %s1605_s10 = scalar_lea.hbm %s2246_s4, 256 }
 0x167   : > { %p1602_p11 = scmp.ne.s32.totalorder %s2170_s12, %s1601_s24  ;;  %p1606_p0 = scmp.lt.u32.totalorder %s2170_s12, %s2246_s4 }
 0x168   : > { %p1607_p1 = scmp.lt.u32.totalorder %s1605_s10, %s1601_s24  ;;  %p1609_p3 = scmp.lt.u32.totalorder %s1601_s24, %s2170_s12 }
 0x169   : > { %p1603_p12 = pnand %p1602_p11, %p1739_p4 }
 0x16a   : > { %p1608_p2 = por %p1607_p1, %p1606_p0 }
 0x16b   : > { %p1604_p13 = pneg %p1603_p12 }
 0x16c   : > { %p1610_p5 = por %p1609_p3, %p1608_p2 }
 0x16e   : > { %p1611_p6 = pnand %p1610_p5, %p1604_p13 }
 0x170   : > { %1614 = shalt.err (!%p1611_p6)
}
 0x171   : > { %1480 = dma.vmem_to_hbm [thread:$0]  (%p1739_p4), %s2172_s7, 128, %s2170_s12, %s1127_s14  }
 0x172 PF: > { %p1490_p7 = scmp.ge.s32.totalorder %s1669_s20, 2  ;;  %s1177_s8 = sand.u32 1, %s1649_s15  }
 0x173   : > { %s1178_s9 = scalar_lea.sflag [#allocation4], %s1177_s8 }
 0x174   : > { %p1484_p9 = pnand %p1490_p7, %p1746_p8 }
 0x176   : > { %1640 = dma.done.wait (!%p1484_p9), %s1178_s9, 128  }
 0x177   : > { %1642 = vsyncadd (!%p1484_p9), %s1178_s9, 4294967168  ;;  %s1187_s18 = scalar_lea.sflag [#allocation6], %s1177_s8 }
 0x178   : > { %1644 = dma.done.wait (!%p1484_p9), %s1187_s18, 128  }
 0x179   : > { %1646 = vsyncadd (!%p1484_p9), %s1187_s18, 4294967168  ;;  %s21_s20 = sadd.s32 1, %s1669_s20   ;;  %s2249_s15 = smov %s1653_s16 }
 0x17a   : > { %p18_p10 = scmp.ge.s32.totalorder %s21_s20, 4   ;;  %s2250_s16 = smov %s1657_s17 }
 0x17b   : > { %s2251_s17 = smov %s1752_s28  ;;  %s2252_s18 = smov %s1665_s19 }
 0x17c   : > { %s2253_s19 = smov %s2255_s23  ;;  %20 = sbr.rel (!%p18_p10) target bundleno = 6 (0x6), region = 103 }
 0x183   :  { %1192 = vsyncpa [#allocation4], 1 }
 0x184   :  { %1194 = vsyncpa [#allocation4 + $0x1], 1 }
 0x185   :  { %1195 = vsyncpa [#allocation6], 1 }
 0x186   :  { %1197 = vsyncpa [#allocation6 + $0x1], 1 }

</bundles_post_ra>
